<compile_context>
chip_gen: v5e
topology: v5e:2x2
jax: 0.10.0
libtpu: 0.0.40
codegen_flags: <defaults>
</compile_context>

<pallas_src>
import math

import jax
import jax.numpy as jnp
from jax.experimental import pallas as pl
from jax.experimental.pallas import tpu as pltpu

_LANE = 128      # lane width (last-dim alignment for dense vector stores)
_SUBLANE = 8     # f32 sublane height (second-to-last dim alignment)

# Conservative on-chip budget valid on every current chip (v7x has 64 MiB VMEM
# per TensorCore; leave room for Mosaic internal scratch).
_VMEM_BUDGET = 40 << 20
_VMEM_HEADROOM = 6 << 20


def _round_up(n, m):
    return ((n + m - 1) // m) * m


def sae_kernel(x_ref, w1_ref, b1_ref, w2_ref, b2_ref, w3_ref, b3_ref,
               w4_ref, b4_ref, out_ref):
    """Fused 4-layer MLP on one batch tile: sigmoid(fc1..fc3) -> fc4."""

    def linear(h, w_ref, b_ref):
        # MXU matmul with f32 accumulation + broadcasted bias add (VPU).
        return jnp.dot(h, w_ref[...], preferred_element_type=jnp.float32) + b_ref[...]

    def sigmoid(z):
        # tanh form: one EUP op + two VPU ops; no divide, no exp overflow.
        return 0.5 * jnp.tanh(0.5 * z) + 0.5

    h = sigmoid(linear(x_ref[...], w1_ref, b1_ref))   # (TB, 30)
    h = sigmoid(linear(h, w2_ref, b2_ref))            # (TB, 20)
    h = sigmoid(linear(h, w3_ref, b3_ref))            # (TB, 10)
    out_ref[...] = linear(h, w4_ref, b4_ref).astype(out_ref.dtype)  # (TB, Np)


def sae_forward(x, params, *, batch_tile=512):
    """Batch-tiled Pallas forward. Returns (batch, nb_movies) float32."""
    (w1, b1), (w2, b2), (w3, b3), (w4, b4) = params
    batch, nb_movies = x.shape
    h1, h2, h3 = w1.shape[1], w2.shape[1], w3.shape[1]

    # --- Lane-dense padding of the movie axis (zero pad keeps math exact). ---
    np_pad = _round_up(nb_movies, _LANE)
    dm = np_pad - nb_movies
    x_p = jnp.pad(x, ((0, 0), (0, dm))) if dm else x
    w1_p = jnp.pad(w1, ((0, dm), (0, 0))) if dm else w1          # extra input rows = 0
    w4_p = jnp.pad(w4, ((0, 0), (0, dm))) if dm else w4          # extra output cols = 0
    b4_p = jnp.pad(b4, ((0, 0), (0, dm))) if dm else b4

    # --- Resident-parameter footprint (allow 2x for Pallas buffer allocation). ---
    weights_bytes = 4 * (np_pad * h1 + h1 + h1 * h2 + h2 + h2 * h3 + h3
                         + h3 * np_pad + np_pad)

    # --- Batch tile: sublane-aligned and capped so double-buffered x/out tiles
    #     plus resident params fit the VMEM budget on every chip generation. ---
    bytes_per_tile_row = 4 * np_pad
    avail = _VMEM_BUDGET - 2 * weights_bytes - _VMEM_HEADROOM
    tb_cap = max(_SUBLANE, (avail // (4 * bytes_per_tile_row)) // _SUBLANE * _SUBLANE)
    tb = min(batch_tile, tb_cap, _round_up(batch, _SUBLANE))
    tb = max(_SUBLANE, _round_up(tb, _SUBLANE))

    b_pad = _round_up(batch, tb)
    if b_pad != batch:
        x_p = jnp.pad(x_p, ((0, b_pad - batch), (0, 0)))
    grid = (b_pad // tb,)

    # Explicit VMEM limit: what we actually use, capped below physical on v7x.
    tile_bytes = tb * np_pad * 4
    vmem_bytes = int(4 * tile_bytes + 2 * weights_bytes + _VMEM_HEADROOM)
    vmem_bytes = min(max(vmem_bytes, 16 << 20), 56 << 20)

    # --- Cost estimate (helps XLA schedule the custom call). ---
    flops = 2 * batch * (nb_movies * h1 + h1 * h2 + h2 * h3 + h3 * nb_movies)
    transcendentals = batch * (h1 + h2 + h3)
    bytes_accessed = 4 * (2 * batch * nb_movies
                          + nb_movies * h1 + h1 * h2 + h2 * h3 + h3 * nb_movies
                          + h1 + h2 + h3 + nb_movies)

    tile_spec = pl.BlockSpec((tb, np_pad), lambda i: (i, 0))

    # Full-array blocks with a constant index_map: fetched once, VMEM-resident
    # across every grid step.
    def resident(shape):
        return pl.BlockSpec(shape, lambda i: (0, 0))

    out_p = pl.pallas_call(
        sae_kernel,
        out_shape=jax.ShapeDtypeStruct((b_pad, np_pad), jnp.float32),
        grid=grid,
        in_specs=[
            tile_spec,                       # x tile (streamed)
            resident(w1_p.shape), resident(b1.shape),
            resident(w2.shape), resident(b2.shape),
            resident(w3.shape), resident(b3.shape),
            resident(w4_p.shape), resident(b4_p.shape),
        ],
        out_specs=tile_spec,
        compiler_params=pltpu.CompilerParams(
            dimension_semantics=("parallel",),
            vmem_limit_bytes=vmem_bytes,
        ),
        cost_estimate=pl.CostEstimate(
            flops=flops,
            transcendentals=transcendentals,
            bytes_accessed=bytes_accessed,
        ),
    )(x_p, w1_p, b1, w2, b2, w3, b3, w4_p, b4_p)

    return out_p[:batch, :nb_movies]


def init_linear(key, in_features, out_features):
    """Deterministic init matching PyTorch's default: U(-1/sqrt(fan_in), 1/sqrt(fan_in))."""
    kw, kb = jax.random.split(key)
    bound = 1.0 / math.sqrt(in_features)
    w = jax.random.uniform(kw, (in_features, out_features), jnp.float32,
                           minval=-bound, maxval=bound)
    b = jax.random.uniform(kb, (1, out_features), jnp.float32,
                           minval=-bound, maxval=bound)
    return w, b


def reference_forward(x, params):
    (w1, b1), (w2, b2), (w3, b3), (w4, b4) = params
    h = jax.nn.sigmoid(x @ w1 + b1)
    h = jax.nn.sigmoid(h @ w2 + b2)
    h = jax.nn.sigmoid(h @ w3 + b3)
    return h @ w4 + b4


if __name__ == "__main__":
    nb_movies = 64   # small synthetic stand-in for the dataset-derived movie count
    batch = 8

    root = jax.random.PRNGKey(0)
    k_x, k1, k2, k3, k4 = jax.random.split(root, 5)

    # Ratings-like input in [0, 5].
    x = jax.random.uniform(k_x, (batch, nb_movies), jnp.float32, minval=0.0, maxval=5.0)

    params = (
        init_linear(k1, nb_movies, 30),   # fc1
        init_linear(k2, 30, 20),          # fc2
        init_linear(k3, 20, 10),          # fc3
        init_linear(k4, 10, nb_movies),   # fc4 (see TODO(synk) above)
    )

    out = sae_forward(x, params)
    out = jax.block_until_ready(out)

    ref = reference_forward(x, params)
    assert out.shape == (batch, nb_movies)
    assert jnp.allclose(out, ref, atol=1e-5, rtol=1e-5), float(jnp.max(jnp.abs(out - ref)))

    print("KERNEL_OK")
</pallas_src>

<mosaic_0001>
module attributes {stable_mosaic.version = 11 : i64} {
  func.func @sae_kernel(%arg0: i32, %arg1: memref<8x128xf32, #tpu.memory_space<vmem>>, %arg2: memref<128x30xf32, #tpu.memory_space<vmem>>, %arg3: memref<1x30xf32, #tpu.memory_space<vmem>>, %arg4: memref<30x20xf32, #tpu.memory_space<vmem>>, %arg5: memref<1x20xf32, #tpu.memory_space<vmem>>, %arg6: memref<20x10xf32, #tpu.memory_space<vmem>>, %arg7: memref<1x10xf32, #tpu.memory_space<vmem>>, %arg8: memref<10x128xf32, #tpu.memory_space<vmem>>, %arg9: memref<1x128xf32, #tpu.memory_space<vmem>>, %arg10: memref<8x128xf32, #tpu.memory_space<vmem>>) attributes {dimension_semantics = [#tpu.dimension_semantics<parallel>], iteration_bounds = array<i64: 1>, scalar_prefetch = 0 : i64, scratch_operands = 0 : i64, tpu.core_type = #tpu.core_type<tc>, window_params = [{transform_indices = @transform_0, window_bounds = array<i64: 8, 128>}, {pipeline_mode = #tpu.pipeline_mode<synchronous>, transform_indices = @transform_1, window_bounds = array<i64: 128, 30>}, {pipeline_mode = #tpu.pipeline_mode<synchronous>, transform_indices = @transform_2, window_bounds = array<i64: 1, 30>}, {pipeline_mode = #tpu.pipeline_mode<synchronous>, transform_indices = @transform_3, window_bounds = array<i64: 30, 20>}, {pipeline_mode = #tpu.pipeline_mode<synchronous>, transform_indices = @transform_4, window_bounds = array<i64: 1, 20>}, {pipeline_mode = #tpu.pipeline_mode<synchronous>, transform_indices = @transform_5, window_bounds = array<i64: 20, 10>}, {pipeline_mode = #tpu.pipeline_mode<synchronous>, transform_indices = @transform_6, window_bounds = array<i64: 1, 10>}, {pipeline_mode = #tpu.pipeline_mode<synchronous>, transform_indices = @transform_7, window_bounds = array<i64: 10, 128>}, {pipeline_mode = #tpu.pipeline_mode<synchronous>, transform_indices = @transform_8, window_bounds = array<i64: 1, 128>}, {transform_indices = @transform_9, window_bounds = array<i64: 8, 128>}]} {
    %c0 = arith.constant 0 : index
    %c0_0 = arith.constant 0 : index
    %0 = vector.load %arg1[%c0, %c0_0] : memref<8x128xf32, #tpu.memory_space<vmem>>, vector<8x128xf32>
    %c0_1 = arith.constant 0 : index
    %c0_2 = arith.constant 0 : index
    %1 = vector.load %arg2[%c0_1, %c0_2] : memref<128x30xf32, #tpu.memory_space<vmem>>, vector<128x30xf32>
    %cst = arith.constant dense<0.000000e+00> : vector<8x30xf32>
    %2 = tpu.matmul %0, %1, %cst {dimension_numbers = #tpu.dot_dimension_numbers<[1], [0], [0], [1], [0, 0, 1, 1], [], []>} : vector<8x128xf32>, vector<128x30xf32>, vector<8x30xf32> -> vector<8x30xf32>
    %c0_3 = arith.constant 0 : index
    %c0_4 = arith.constant 0 : index
    %3 = vector.load %arg3[%c0_3, %c0_4] : memref<1x30xf32, #tpu.memory_space<vmem>>, vector<1x30xf32>
    %4 = vector.broadcast %3 : vector<1x30xf32> to vector<8x30xf32>
    %5 = arith.addf %2, %4 : vector<8x30xf32>
    %cst_5 = arith.constant 5.000000e-01 : f32
    %6 = vector.broadcast %cst_5 : f32 to vector<8x30xf32>
    %7 = arith.mulf %6, %5 : vector<8x30xf32>
    %8 = math.tanh %7 : vector<8x30xf32>
    %cst_6 = arith.constant 5.000000e-01 : f32
    %9 = vector.broadcast %cst_6 : f32 to vector<8x30xf32>
    %10 = arith.mulf %9, %8 : vector<8x30xf32>
    %cst_7 = arith.constant 5.000000e-01 : f32
    %11 = vector.broadcast %cst_7 : f32 to vector<8x30xf32>
    %12 = arith.addf %10, %11 : vector<8x30xf32>
    %c0_8 = arith.constant 0 : index
    %c0_9 = arith.constant 0 : index
    %13 = vector.load %arg4[%c0_8, %c0_9] : memref<30x20xf32, #tpu.memory_space<vmem>>, vector<30x20xf32>
    %cst_10 = arith.constant dense<0.000000e+00> : vector<8x20xf32>
    %14 = tpu.matmul %12, %13, %cst_10 {dimension_numbers = #tpu.dot_dimension_numbers<[1], [0], [0], [1], [0, 0, 1, 1], [], []>} : vector<8x30xf32>, vector<30x20xf32>, vector<8x20xf32> -> vector<8x20xf32>
    %c0_11 = arith.constant 0 : index
    %c0_12 = arith.constant 0 : index
    %15 = vector.load %arg5[%c0_11, %c0_12] : memref<1x20xf32, #tpu.memory_space<vmem>>, vector<1x20xf32>
    %16 = vector.broadcast %15 : vector<1x20xf32> to vector<8x20xf32>
    %17 = arith.addf %14, %16 : vector<8x20xf32>
    %cst_13 = arith.constant 5.000000e-01 : f32
    %18 = vector.broadcast %cst_13 : f32 to vector<8x20xf32>
    %19 = arith.mulf %18, %17 : vector<8x20xf32>
    %20 = math.tanh %19 : vector<8x20xf32>
    %cst_14 = arith.constant 5.000000e-01 : f32
    %21 = vector.broadcast %cst_14 : f32 to vector<8x20xf32>
    %22 = arith.mulf %21, %20 : vector<8x20xf32>
    %cst_15 = arith.constant 5.000000e-01 : f32
    %23 = vector.broadcast %cst_15 : f32 to vector<8x20xf32>
    %24 = arith.addf %22, %23 : vector<8x20xf32>
    %c0_16 = arith.constant 0 : index
    %c0_17 = arith.constant 0 : index
    %25 = vector.load %arg6[%c0_16, %c0_17] : memref<20x10xf32, #tpu.memory_space<vmem>>, vector<20x10xf32>
    %cst_18 = arith.constant dense<0.000000e+00> : vector<8x10xf32>
    %26 = tpu.matmul %24, %25, %cst_18 {dimension_numbers = #tpu.dot_dimension_numbers<[1], [0], [0], [1], [0, 0, 1, 1], [], []>} : vector<8x20xf32>, vector<20x10xf32>, vector<8x10xf32> -> vector<8x10xf32>
    %c0_19 = arith.constant 0 : index
    %c0_20 = arith.constant 0 : index
    %27 = vector.load %arg7[%c0_19, %c0_20] : memref<1x10xf32, #tpu.memory_space<vmem>>, vector<1x10xf32>
    %28 = vector.broadcast %27 : vector<1x10xf32> to vector<8x10xf32>
    %29 = arith.addf %26, %28 : vector<8x10xf32>
    %cst_21 = arith.constant 5.000000e-01 : f32
    %30 = vector.broadcast %cst_21 : f32 to vector<8x10xf32>
    %31 = arith.mulf %30, %29 : vector<8x10xf32>
    %32 = math.tanh %31 : vector<8x10xf32>
    %cst_22 = arith.constant 5.000000e-01 : f32
    %33 = vector.broadcast %cst_22 : f32 to vector<8x10xf32>
    %34 = arith.mulf %33, %32 : vector<8x10xf32>
    %cst_23 = arith.constant 5.000000e-01 : f32
    %35 = vector.broadcast %cst_23 : f32 to vector<8x10xf32>
    %36 = arith.addf %34, %35 : vector<8x10xf32>
    %c0_24 = arith.constant 0 : index
    %c0_25 = arith.constant 0 : index
    %37 = vector.load %arg8[%c0_24, %c0_25] : memref<10x128xf32, #tpu.memory_space<vmem>>, vector<10x128xf32>
    %cst_26 = arith.constant dense<0.000000e+00> : vector<8x128xf32>
    %38 = tpu.matmul %36, %37, %cst_26 {dimension_numbers = #tpu.dot_dimension_numbers<[1], [0], [0], [1], [0, 0, 1, 1], [], []>} : vector<8x10xf32>, vector<10x128xf32>, vector<8x128xf32> -> vector<8x128xf32>
    %c0_27 = arith.constant 0 : index
    %c0_28 = arith.constant 0 : index
    %39 = vector.load %arg9[%c0_27, %c0_28] : memref<1x128xf32, #tpu.memory_space<vmem>>, vector<1x128xf32>
    %40 = vector.broadcast %39 : vector<1x128xf32> to vector<8x128xf32>
    %41 = arith.addf %38, %40 : vector<8x128xf32>
    %c0_29 = arith.constant 0 : index
    %c0_30 = arith.constant 0 : index
    %42 = vector.load %arg10[%c0_29, %c0_30] : memref<8x128xf32, #tpu.memory_space<vmem>>, vector<8x128xf32>
    tpu.vector_store %arg10[%c0_29, %c0_30], %41 {strides = array<i32>} : memref<8x128xf32, #tpu.memory_space<vmem>>, vector<8x128xf32>,
    return
  }
  func.func @transform_0(%arg0: i32) -> (i32, i32) {
    %c0_i32 = arith.constant 0 : i32
    %c0_i32_0 = arith.constant 0 : i32
    return %arg0, %c0_i32 : i32, i32
  }
  func.func @transform_1(%arg0: i32) -> (i32, i32) {
    %c0_i32 = arith.constant 0 : i32
    %c0_i32_0 = arith.constant 0 : i32
    %c0_i32_1 = arith.constant 0 : i32
    return %c0_i32, %c0_i32_0 : i32, i32
  }
  func.func @transform_2(%arg0: i32) -> (i32, i32) {
    %c0_i32 = arith.constant 0 : i32
    %c0_i32_0 = arith.constant 0 : i32
    %c0_i32_1 = arith.constant 0 : i32
    return %c0_i32, %c0_i32_0 : i32, i32
  }
  func.func @transform_3(%arg0: i32) -> (i32, i32) {
    %c0_i32 = arith.constant 0 : i32
    %c0_i32_0 = arith.constant 0 : i32
    %c0_i32_1 = arith.constant 0 : i32
    return %c0_i32, %c0_i32_0 : i32, i32
  }
  func.func @transform_4(%arg0: i32) -> (i32, i32) {
    %c0_i32 = arith.constant 0 : i32
    %c0_i32_0 = arith.constant 0 : i32
    %c0_i32_1 = arith.constant 0 : i32
    return %c0_i32, %c0_i32_0 : i32, i32
  }
  func.func @transform_5(%arg0: i32) -> (i32, i32) {
    %c0_i32 = arith.constant 0 : i32
    %c0_i32_0 = arith.constant 0 : i32
    %c0_i32_1 = arith.constant 0 : i32
    return %c0_i32, %c0_i32_0 : i32, i32
  }
  func.func @transform_6(%arg0: i32) -> (i32, i32) {
    %c0_i32 = arith.constant 0 : i32
    %c0_i32_0 = arith.constant 0 : i32
    %c0_i32_1 = arith.constant 0 : i32
    return %c0_i32, %c0_i32_0 : i32, i32
  }
  func.func @transform_7(%arg0: i32) -> (i32, i32) {
    %c0_i32 = arith.constant 0 : i32
    %c0_i32_0 = arith.constant 0 : i32
    %c0_i32_1 = arith.constant 0 : i32
    return %c0_i32, %c0_i32_0 : i32, i32
  }
  func.func @transform_8(%arg0: i32) -> (i32, i32) {
    %c0_i32 = arith.constant 0 : i32
    %c0_i32_0 = arith.constant 0 : i32
    %c0_i32_1 = arith.constant 0 : i32
    return %c0_i32, %c0_i32_0 : i32, i32
  }
  func.func @transform_9(%arg0: i32) -> (i32, i32) {
    %c0_i32 = arith.constant 0 : i32
    %c0_i32_0 = arith.constant 0 : i32
    return %arg0, %c0_i32 : i32, i32
  }
}

</mosaic_0001>

<bundles_post_ra>
// kernel: tpu_custom_call.1
= control target key start
LH: loop header
LB: loop body
LE: loop exit
PB: predicated region body
PF: predicated region fallthrough
CT: control target
= control target key end

     0   :  { %s395_s0 = inlined_call_operand.vmem [shape: f32[8,128], index: 0, kind: input, shape index: {}]   ;;  %s396_s1 = inlined_call_operand.vmem [shape: f32[128,30], index: 1, kind: input, shape index: {}]   ;;  %s397_s2 = inlined_call_operand.vmem [shape: f32[1,30], index: 2, kind: input, shape index: {}]   ;;  %s398_s3 = inlined_call_operand.vmem [shape: f32[30,20], index: 3, kind: input, shape index: {}]   ;;  %s399_s4 = inlined_call_operand.vmem [shape: f32[1,20], index: 4, kind: input, shape index: {}]   ;;  %s400_s5 = inlined_call_operand.vmem [shape: f32[20,10], index: 5, kind: input, shape index: {}]   ;;  %s401_s6 = inlined_call_operand.vmem [shape: f32[1,10], index: 6, kind: input, shape index: {}]   ;;  %s402_s7 = inlined_call_operand.vmem [shape: f32[10,128], index: 7, kind: input, shape index: {}]   ;;  %s403_s8 = inlined_call_operand.vmem [shape: f32[1,128], index: 8, kind: input, shape index: {}]   ;;  %s404_s9 = inlined_call_operand.hbm [shape: f32[8,128], index: 9, kind: output, shape index: {}]  }
   0x1   :  { %v49_v0 = vld [vmem:[%s396_s1 + $0x78] sm:$0xff]  ;;  %v48_v1 = vld [vmem:[%s396_s1 + $0x70] sm:$0xff]  ;;  %v47_v2 = vld [vmem:[%s396_s1 + $0x68] sm:$0xff] }
   0x2   :  { %54 = vmatpush.msra.mxu0 %v49_v0  ;;  %v46_v3 = vld [vmem:[%s396_s1 + $0x60] sm:$0xff]  ;;  %v45_v4 = vld [vmem:[%s396_s1 + $0x58] sm:$0xff] }
   0x4   :  { %55 = vmatpush.msra.mxu0 %v48_v1 }
   0x6   :  { %56 = vmatpush.msra.mxu0 %v47_v2 }
   0x8   :  { %57 = vmatpush.msra.mxu0 %v46_v3 }
   0x9   :  { %14 = vsyncpa [#allocation3], 0  ;;  %v44_v5 = vld [vmem:[%s396_s1 + $0x50] sm:$0xff]  ;;  %v43_v6 = vld [vmem:[%s396_s1 + $0x48] sm:$0xff]  ;;  %vm90_vm0 = vcmask 1045504   ;;  %vm86_vm1 = vcmask 244736  }
   0xa   :  { %58 = vmatpush.msra.mxu0 %v45_v4  ;;  %v42_v7 = vld [vmem:[%s396_s1 + $0x40] sm:$0xff]  ;;  %v41_v8 = vld [vmem:[%s396_s1 + $0x38] sm:$0xff]  ;;  %v40_v9 = vld [vmem:[%s396_s1 + $0x30] sm:$0xff]  ;;  %vm129_vm2 = vcmask 1043456   ;;  %vm125_vm3 = vcmask 162816   ;;  %vm167_vm4 = vcmask 1041408  }
   0xb   :  { %v39_v10 = vld [vmem:[%s396_s1 + $0x28] sm:$0xff]  ;;  %v38_v11 = vld [vmem:[%s396_s1 + $0x20] sm:$0xff]  ;;  %v37_v12 = vld [vmem:[%s396_s1 + $0x18] sm:$0xff]  ;;  %vm163_vm5 = vcmask 80896   ;;  %s251_s21 = smov [#allocation2]   ;;  %s199_s24 = sshll.u32 %s404_s9, 4  ;;  %s200_s24 = int_to_ptr.hbm [resolvable:$true] %s199_s24 }
   0xc   :  { %59 = vmatpush.msra.mxu0 %v44_v5  ;;  %v36_v13 = vld [vmem:[%s396_s1 + $0x10] sm:$0xff]  ;;  %v35_v14 = vld [vmem:[%s396_s1 + $0x8] sm:$0xff]  ;;  %v34_v15 = vld [vmem:[%s396_s1] sm:$0xff] }
   0xd   :  { %v33_v16 = vld [vmem:[%s395_s0] sm:$0xff]  ;;  %v81_v17 = vld [vmem:[%s398_s3 + $0x18] sm:$0x3f]  ;;  %v80_v18 = vld [vmem:[%s398_s3 + $0x10] sm:$0xff] }
   0xe   :  { %60 = vmatpush.msra.mxu0 %v43_v6  ;;  %208 = vmatpush.msk.msra.mxu1 %vm90_vm0, %v81_v17  ;;  %v79_v19 = vld [vmem:[%s398_s3 + $0x8] sm:$0xff]  ;;  %v78_v20 = vld [vmem:[%s398_s3] sm:$0xff]  ;;  %v120_v28 = vld [vmem:[%s400_s5 + $0x10] sm:$0xf] }
   0xf   :  { %v215_v21 = vld [vmem:[%s397_s2] ss:$0 sm:$0xff]  ;;  %210 = vmatpush.msk.msra.mxu2 %vm129_vm2, %v120_v28  ;;  %v119_v29 = vld [vmem:[%s400_s5 + $0x8] sm:$0xff] }
  0x10   :  { %61 = vmatpush.msra.mxu0 %v42_v7  ;;  %107 = vmatpush.msra.mxu1 %v80_v18  ;;  %v118_v30 = vld [vmem:[%s400_s5] sm:$0xff]  ;;  %v158_v38 = vld [vmem:[%s402_s7 + $0x8] sm:$0x3] }
  0x11   :  { %147 = vmatpush.msra.mxu2 %v119_v29  ;;  %v216_v31 = vld [vmem:[%s399_s4] ss:$0 sm:$0xff]  ;;  %212 = vmatpush.msk.msra.mxu3 %vm167_vm4, %v158_v38 }
  0x12   :  { %62 = vmatpush.msra.mxu0 %v41_v8  ;;  %108 = vmatpush.msra.mxu1 %v79_v19  ;;  %v157_v39 = vld [vmem:[%s402_s7] sm:$0xff]  ;;  %s197_s7 = sshll.u32 %s251_s21, 4  ;;  %s198_s7 = int_to_ptr.vmem [resolvable:$true] %s197_s7 }
  0x13   :  { %148 = vmatpush.msra.mxu2 %v118_v30  ;;  %186 = vmatpush.msra.mxu3 %v157_v39  ;;  %v217_v40 = vld [vmem:[%s401_s6] ss:$0 sm:$0xff] }
  0x14   :  { %63 = vmatpush.msra.mxu0 %v40_v9  ;;  %109 = vmatpush.msra.mxu1 %v78_v20  ;;  %v218_v47 = vld [vmem:[%s403_s8] ss:$0 sm:$0xff] }
  0x16   :  { %64 = vmatpush.msra.mxu0 %v39_v10 }
  0x18   :  { %65 = vmatpush.msra.mxu0 %v38_v11 }
  0x1a   :  { %66 = vmatpush.msra.mxu0 %v37_v12 }
  0x1c   :  { %67 = vmatpush.msra.mxu0 %v36_v13 }
  0x1e   :  { %68 = vmatpush.msra.mxu0 %v35_v14 }
  0x20   :  { %69 = vmatpush.msra.mxu0 %v34_v15 }
  0x21   :  { %70 = vmatmul.f32.vlgmr.msra.gmra.mxu0 %v33_v16 }
  0x9e   :  { %v71_v22 = vpop.f32.mrf.mxu0 }
  0x9f   :  { %v72_v23 = vadd.f32 %v215_v21, %v71_v22 }
  0xa1   :  { %v74_v24 = vmul.f32 0.5, %v72_v23 }
  0xa3   :  { %219 = vtanh.f32 %v74_v24 }
  0xa9   :  { %v220_v25 = vpop.eup %219 }
  0xaa   :  { %v76_v26 = vmul.f32 0.5, %v220_v25 }
  0xac   :  { %v77_v27 = vadd.f32 0.5, %v76_v26 }
  0xae   :  { %209 = vmatmul.msk.f32.vlgmr.msra.gmra.mxu1 %vm86_vm1, %v77_v27 }
 0x12b   :  { %v111_v32 = vpop.f32.mrf.mxu1 }
 0x12c   :  { %v112_v33 = vadd.f32 %v216_v31, %v111_v32 }
 0x12e   :  { %v114_v34 = vmul.f32 0.5, %v112_v33 }
 0x130   :  { %221 = vtanh.f32 %v114_v34 }
 0x136   :  { %v222_v35 = vpop.eup %221 }
 0x137   :  { %v116_v36 = vmul.f32 0.5, %v222_v35 }
 0x139   :  { %v117_v37 = vadd.f32 0.5, %v116_v36 }
 0x13b   :  { %211 = vmatmul.msk.f32.vlgmr.msra.gmra.mxu2 %vm125_vm3, %v117_v37 }
 0x1be   :  { %v150_v41 = vpop.f32.mrf.mxu2 }
 0x1bf   :  { %v151_v42 = vadd.f32 %v217_v40, %v150_v41 }
 0x1c1   :  { %v153_v43 = vmul.f32 0.5, %v151_v42 }
 0x1c3   :  { %223 = vtanh.f32 %v153_v43 }
 0x1c9   :  { %v224_v44 = vpop.eup %223 }
 0x1ca   :  { %v155_v45 = vmul.f32 0.5, %v224_v44 }
 0x1cc   :  { %v156_v46 = vadd.f32 0.5, %v155_v45 }
 0x1ce   :  { %213 = vmatmul.msk.f32.vlgmr.msra.gmra.mxu3 %vm163_vm5, %v156_v46 }
 0x251   :  { %v188_v48 = vpop.f32.mrf.mxu3 }
 0x252   :  { %v189_v49 = vadd.f32 %v218_v47, %v188_v48 }
 0x254   :  { %191 = vst [vmem:[#allocation2] sm:$0xff] %v189_v49 }
 0x255   :  { %202 = dma.vmem_to_hbm [thread:$0]  %s198_s7, 128, %s200_s24, [#allocation3]  }
 0x256   :  { %249 = dma.done.wait [#allocation3], 128  }
 0x257   :  { %250 = vsyncadd [#allocation3], 4294967168 }
 0x258   :  { %207 = vsyncpa [#allocation3], 1 }

</bundles_post_ra>
